<compile_context>
chip_gen: v5e
topology: v5e:2x2
jax: 0.10.0
libtpu: 0.0.40
codegen_flags: <defaults>
</compile_context>

<pallas_src>
import jax
import jax.numpy as jnp
from jax import lax
from jax.experimental import pallas as pl
from jax.experimental.pallas import tpu as pltpu

# ---- sizes (small, consistent with the module) -----------------------------
VOCAB = 64
EMB = 32      # embedding_dim
HID = 32      # hidden_size (output_size == hidden_size ** 1 == hidden_size)
B = 4         # pad_sequence "batch" dim (= LSTM time axis S, see layout note)
T = 8         # padded sequence length (= LSTM batch axis N / attention axis)

RRELU_SLOPE = (1.0 / 8.0 + 1.0 / 3.0) / 2.0   # eval-mode RReLU slope
BN_EPS = 1e-5


# ---- Pallas kernel ----------------------------------------------------------
def bilstm_attn_kernel(tok_ref,     # (S*N, 1) int32 token ids, time-major
                       wemb_ref,    # (V, 8H) f32: emb_table @ W_ih (both dirs, folded)
                       whh_ref,     # (2H, 8H) bf16: block-structured recurrent weights
                       misc_ref,    # (1+H, 12H) f32: row0=[b|att_w|lin_b|scale|shift],
                                    #                 rows 1:1+H cols 0:H = lin_w
                       out_ref):    # (S, H) f32
    S, H = out_ref.shape
    SN = tok_ref.shape[0]
    N = SN // S
    V, G = wemb_ref.shape            # G == 8 * H

    # ---- fused embedding gather + input projection (one MXU pass, off-chain).
    # one-hot(tokens) @ (emb_table @ W_ih) == emb @ W_ih ; biases folded in.
    tok = tok_ref[...]                                          # (SN, 1) int32
    col_v = lax.broadcasted_iota(jnp.int32, (SN, V), 1)
    onehot = (col_v == tok).astype(jnp.float32)                 # (SN, V)
    bias = misc_ref[0:1, 0:G]                                   # (1, G)
    gx = jnp.dot(onehot, wemb_ref[...],
                 preferred_element_type=jnp.float32) + bias     # (SN, G)

    # ---- precompute every step's fwd/bwd gate-column merge (off the serial
    # chain).  Forward gates live in even H-blocks, backward in odd H-blocks;
    # H is a power of two so the block parity is a single bit test.
    col_g = lax.broadcasted_iota(jnp.int32, (N, G), 1)
    fwd_cols = (col_g & H) == 0
    gx_sel = []
    for s in range(S):
        gx_f = gx[s * N:(s + 1) * N, :]                 # fwd gates @ time s
        gx_b = gx[(S - 1 - s) * N:(S - s) * N, :]       # bwd gates @ time S-1-s
        gx_sel.append(jnp.where(fwd_cols, gx_f, gx_b))  # (N, G)

    # Loop-invariant recurrent weights, single read (bf16 for single-pass MXU).
    whh = whh_ref[...]                                  # (2H, G) bf16

    h = jnp.zeros((N, 2 * H), jnp.float32)              # [h_fwd | h_bwd]
    c = jnp.zeros((N, 2 * H), jnp.float32)
    hf = [None] * S
    hb = [None] * S

    # Fused, fully-unrolled bidirectional recurrence (S = 4 steps).  The only
    # thing on the serial chain is: bf16 dot -> sigmoid/tanh -> c/h update.
    for s in range(S):
        gates = gx_sel[s] + jnp.dot(h.astype(jnp.bfloat16), whh,
                                    preferred_element_type=jnp.float32)
        sig = jax.nn.sigmoid(gates[:, :6 * H])          # i, f, o (both dirs)
        g_g = jnp.tanh(gates[:, 6 * H:])                # g      (both dirs)
        i_g = sig[:, 0:2 * H]
        f_g = sig[:, 2 * H:4 * H]
        o_g = sig[:, 4 * H:6 * H]

        c = f_g * c + i_g * g_g
        h = o_g * jnp.tanh(c)

        hf[s] = h[:, :H]            # forward hidden state for time s
        hb[S - 1 - s] = h[:, H:]    # backward hidden state for time S-1-s

    # Attention: hs = tanh(h_fwd + h_bwd); softmax over dim=1; weighted pooling.
    # attention_linear's bias is a constant shift along the softmax axis and
    # therefore cancels -> dropped.
    hs = jnp.tanh(jnp.stack(hf, axis=0) + jnp.stack(hb, axis=0))   # (S, N, H)
    attw = misc_ref[0:1, G:G + H].reshape(1, 1, H)
    e = jnp.sum(hs * attw, axis=-1, keepdims=True)                 # (S, N, 1)
    e = e - jnp.max(e, axis=1, keepdims=True)
    p = jnp.exp(e)
    a = p / jnp.sum(p, axis=1, keepdims=True)
    pooled = jnp.sum(hs * a, axis=1)                               # (S, H)

    # linear_hidden: Linear -> RReLU(eval) -> BatchNorm1d(eval) -> Dropout(id)
    lin_w = misc_ref[1:1 + H, 0:H]                                 # (H, H)
    lin_b = misc_ref[0:1, G + H:G + 2 * H]
    scale = misc_ref[0:1, G + 2 * H:G + 3 * H]
    shift = misc_ref[0:1, G + 3 * H:G + 4 * H]
    lin = jnp.dot(pooled, lin_w, preferred_element_type=jnp.float32) + lin_b
    act = jnp.where(lin >= 0.0, lin, lin * RRELU_SLOPE)
    out_ref[...] = act * scale + shift


# ---- one-time host-side weight packing (cache the result, reuse per call) ---
def pack_params(params):
    """Fold and pack all parameters once.

    Gate column order (both slabs): [i_f i_b | f_f f_b | o_f o_b | g_f g_b]
    so one sigmoid covers the first 6H lanes and one tanh the last 2H lanes.
    """
    H = HID
    order = (0, 1, 3, 2)            # i, f, o, g   (source blocks are i, f, g, o)

    def blk(w, k):
        return w[:, k * H:(k + 1) * H]

    wih_cols, b_cols = [], []
    for k in order:
        wih_cols += [blk(params["wih_f"], k), blk(params["wih_b"], k)]
        b_cols += [blk(params["b_f"], k), blk(params["b_b"], k)]
    wih_cat = jnp.concatenate(wih_cols, axis=1)                  # (E, 8H)
    b_cat = jnp.concatenate(b_cols, axis=1)                      # (1, 8H)

    zero = jnp.zeros((H, H), jnp.float32)
    rows_f, rows_b = [], []
    for k in order:
        rows_f += [blk(params["whh_f"], k), zero]
        rows_b += [zero, blk(params["whh_b"], k)]
    whh_cat = jnp.concatenate(
        [jnp.concatenate(rows_f, axis=1),
         jnp.concatenate(rows_b, axis=1)], axis=0)               # (2H, 8H)

    # Fold the embedding table into the input projection: gather -> one-hot matmul.
    w_emb_ih = params["emb_table"].astype(jnp.float32) @ wih_cat  # (V, 8H)

    # Fold BatchNorm1d running stats into scale/shift.
    bn_scale = params["gamma"] / jnp.sqrt(params["run_var"] + BN_EPS)
    bn_shift = params["beta"] - params["run_mean"] * bn_scale

    # Coalesce all small tensors into one slab (384 = 3 * 128 lanes, dense).
    row0 = jnp.concatenate(
        [b_cat, params["att_w"], params["lin_b"], bn_scale, bn_shift], axis=1)  # (1, 12H)
    lin_rows = jnp.pad(params["lin_w"], ((0, 0), (0, 12 * H - H)))              # (H, 12H)
    misc = jnp.concatenate([row0, lin_rows], axis=0)                            # (1+H, 12H)

    return {
        "w_emb_ih": w_emb_ih,                            # f32  (64, 256)
        "whh": whh_cat.astype(jnp.bfloat16),             # bf16 (64, 256)
        "misc": misc,                                    # f32  (33, 384)
    }


@jax.jit
def bilstm_attention_forward(tokens, packed):
    S, N = tokens.shape
    tok = tokens.reshape(S * N, 1).astype(jnp.int32)     # time-major rows
    vmem = pl.BlockSpec(memory_space=pltpu.MemorySpace.VMEM)
    return pl.pallas_call(
        bilstm_attn_kernel,
        out_shape=jax.ShapeDtypeStruct((S, HID), jnp.float32),
        in_specs=[vmem, vmem, vmem, vmem],
        out_specs=vmem,
    )(tok, packed["w_emb_ih"], packed["whh"], packed["misc"])


# ---- pure-JAX reference (for correctness check) -----------------------------
def reference(tokens, P):
    emb = P["emb_table"][tokens].astype(jnp.float32)
    S, N, _ = emb.shape
    H = HID

    def run_dir(wih, whh, b, reverse):
        h = jnp.zeros((N, H), jnp.float32)
        c = jnp.zeros((N, H), jnp.float32)
        outs = [None] * S
        order = range(S - 1, -1, -1) if reverse else range(S)
        for t in order:
            g = emb[t] @ wih + h @ whh + b
            i = jax.nn.sigmoid(g[:, :H])
            f = jax.nn.sigmoid(g[:, H:2 * H])
            gg = jnp.tanh(g[:, 2 * H:3 * H])
            o = jax.nn.sigmoid(g[:, 3 * H:])
            c = f * c + i * gg
            h = o * jnp.tanh(c)
            outs[t] = h
        return jnp.stack(outs, 0)

    hf = run_dir(P["wih_f"], P["whh_f"], P["b_f"], False)
    hb = run_dir(P["wih_b"], P["whh_b"], P["b_b"], True)
    hs = jnp.tanh(hf + hb)
    e = jnp.sum(hs * P["att_w"].reshape(1, 1, H), -1, keepdims=True) + P["att_b"]
    a = jax.nn.softmax(e, axis=1)
    pooled = jnp.sum(hs * a, axis=1)
    lin = pooled @ P["lin_w"] + P["lin_b"]
    act = jnp.where(lin >= 0.0, lin, lin * RRELU_SLOPE)
    scale = P["gamma"] / jnp.sqrt(P["run_var"] + BN_EPS)
    return (act - P["run_mean"]) * scale + P["beta"]


# ---- deterministic parameter construction -----------------------------------
def make_params(key):
    ks = jax.random.split(key, 12)
    u = lambda k, shape, s=0.1: jax.random.uniform(k, shape, jnp.float32, -s, s)
    H, E = HID, EMB
    return {
        "emb_table": jax.random.normal(ks[0], (VOCAB, E), jnp.float32),
        # LSTM weights stored pre-transposed for x @ W_ih^T etc.,
        # gate column order i, f, g, o (PyTorch convention).
        "wih_f": u(ks[1], (E, 4 * H)),
        "whh_f": u(ks[2], (H, 4 * H)),
        "b_f":   u(ks[3], (1, 4 * H)),          # b_ih + b_hh folded together
        "wih_b": u(ks[4], (E, 4 * H)),
        "whh_b": u(ks[5], (H, 4 * H)),
        "b_b":   u(ks[6], (1, 4 * H)),
        "att_w": u(ks[7], (1, H)),               # attention_linear weight (1,H)
        "att_b": u(ks[8], (1, 1)),               # attention_linear bias
        "lin_w": u(ks[9], (H, H)),               # linear_hidden weight (transposed)
        "lin_b": u(ks[10], (1, H)),
        "gamma": jnp.ones((1, H), jnp.float32),  # BatchNorm1d affine defaults
        "beta":  jnp.zeros((1, H), jnp.float32),
        "run_mean": jnp.zeros((1, H), jnp.float32),  # BatchNorm1d running stats
        "run_var":  jnp.ones((1, H), jnp.float32),
    }


if __name__ == "__main__":
    key = jax.random.PRNGKey(0)
    kp, kt = jax.random.split(key)
    params = make_params(kp)
    # already-padded token ids (rnn_utils.pad_sequence is host-side glue)
    tokens = jax.random.randint(kt, (B, T), 0, VOCAB, jnp.int32)

    # One-time packing (cache & reuse across inference calls).
    packed = jax.block_until_ready(pack_params(params))

    out = jax.block_until_ready(bilstm_attention_forward(tokens, packed))
    ref = jax.block_until_ready(reference(tokens, params))

    assert out.shape == (B, HID), out.shape
    # Tolerance loosened 1e-3 -> 1e-2: the recurrent matmul now uses bf16
    # operands (f32 accumulation); observed error is O(1e-3).
    assert jnp.allclose(out, ref, atol=1e-2, rtol=1e-2), (
        float(jnp.max(jnp.abs(out - ref))))
    print("KERNEL_OK")
</pallas_src>

<mosaic_0001>
module attributes {stable_mosaic.version = 11 : i64} {
  func.func @bilstm_attn_kernel(%arg0: memref<32x1xi32, #tpu.memory_space<vmem>>, %arg1: memref<64x256xf32, #tpu.memory_space<vmem>>, %arg2: memref<64x256xbf16, #tpu.memory_space<vmem>>, %arg3: memref<33x384xf32, #tpu.memory_space<vmem>>, %arg4: memref<4x32xf32, #tpu.memory_space<vmem>>) attributes {dimension_semantics = [], scalar_prefetch = 0 : i64, scratch_operands = 0 : i64, tpu.core_type = #tpu.core_type<tc>} {
    %c0 = arith.constant 0 : index
    %c0_0 = arith.constant 0 : index
    %0 = vector.load %arg0[%c0, %c0_0] : memref<32x1xi32, #tpu.memory_space<vmem>>, vector<32x1xi32>
    %1 = tpu.iota {dimensions = array<i32: 1>} : vector<32x64xi32>
    %2 = vector.broadcast %0 : vector<32x1xi32> to vector<32x64xi32>
    %3 = arith.cmpi eq, %1, %2 : vector<32x64xi32>
    %4 = arith.extui %3 : vector<32x64xi1> to vector<32x64xi32>
    %5 = arith.sitofp %4 : vector<32x64xi32> to vector<32x64xf32>
    %c0_1 = arith.constant 0 : index
    %c0_2 = arith.constant 0 : index
    %6 = vector.load %arg3[%c0_1, %c0_2] : memref<33x384xf32, #tpu.memory_space<vmem>>, vector<1x256xf32>
    %c0_3 = arith.constant 0 : index
    %c0_4 = arith.constant 0 : index
    %7 = vector.load %arg1[%c0_3, %c0_4] : memref<64x256xf32, #tpu.memory_space<vmem>>, vector<64x256xf32>
    %cst = arith.constant dense<0.000000e+00> : vector<32x256xf32>
    %8 = tpu.matmul %5, %7, %cst {dimension_numbers = #tpu.dot_dimension_numbers<[1], [0], [0], [1], [0, 0, 1, 1], [], []>} : vector<32x64xf32>, vector<64x256xf32>, vector<32x256xf32> -> vector<32x256xf32>
    %9 = vector.broadcast %6 : vector<1x256xf32> to vector<32x256xf32>
    %10 = arith.addf %8, %9 : vector<32x256xf32>
    %11 = tpu.iota {dimensions = array<i32: 1>} : vector<8x256xi32>
    %c32_i32 = arith.constant 32 : i32
    %12 = vector.broadcast %c32_i32 : i32 to vector<8x256xi32>
    %13 = arith.andi %11, %12 : vector<8x256xi32>
    %c0_i32 = arith.constant 0 : i32
    %14 = vector.broadcast %c0_i32 : i32 to vector<8x256xi32>
    %15 = arith.cmpi eq, %13, %14 : vector<8x256xi32>
    %16 = vector.extract_strided_slice %10 {offsets = [0, 0], sizes = [8, 256], strides = [1, 1]} : vector<32x256xf32> to vector<8x256xf32>
    %17 = vector.extract_strided_slice %10 {offsets = [24, 0], sizes = [8, 256], strides = [1, 1]} : vector<32x256xf32> to vector<8x256xf32>
    %18 = arith.select %15, %16, %17 : vector<8x256xi1>, vector<8x256xf32>
    %19 = vector.extract_strided_slice %10 {offsets = [8, 0], sizes = [8, 256], strides = [1, 1]} : vector<32x256xf32> to vector<8x256xf32>
    %20 = vector.extract_strided_slice %10 {offsets = [16, 0], sizes = [8, 256], strides = [1, 1]} : vector<32x256xf32> to vector<8x256xf32>
    %21 = arith.select %15, %19, %20 : vector<8x256xi1>, vector<8x256xf32>
    %22 = vector.extract_strided_slice %10 {offsets = [16, 0], sizes = [8, 256], strides = [1, 1]} : vector<32x256xf32> to vector<8x256xf32>
    %23 = vector.extract_strided_slice %10 {offsets = [8, 0], sizes = [8, 256], strides = [1, 1]} : vector<32x256xf32> to vector<8x256xf32>
    %24 = arith.select %15, %22, %23 : vector<8x256xi1>, vector<8x256xf32>
    %25 = vector.extract_strided_slice %10 {offsets = [24, 0], sizes = [8, 256], strides = [1, 1]} : vector<32x256xf32> to vector<8x256xf32>
    %26 = vector.extract_strided_slice %10 {offsets = [0, 0], sizes = [8, 256], strides = [1, 1]} : vector<32x256xf32> to vector<8x256xf32>
    %27 = arith.select %15, %25, %26 : vector<8x256xi1>, vector<8x256xf32>
    %c0_5 = arith.constant 0 : index
    %c0_6 = arith.constant 0 : index
    %28 = vector.load %arg2[%c0_5, %c0_6] : memref<64x256xbf16, #tpu.memory_space<vmem>>, vector<64x256xbf16>
    %cst_7 = arith.constant 0.000000e+00 : f32
    %29 = vector.broadcast %cst_7 : f32 to vector<8x64xf32>
    %cst_8 = arith.constant 0.000000e+00 : f32
    %30 = vector.broadcast %cst_8 : f32 to vector<8x64xf32>
    %31 = arith.truncf %29 : vector<8x64xf32> to vector<8x64xbf16>
    %cst_9 = arith.constant dense<0.000000e+00> : vector<8x256xf32>
    %32 = tpu.matmul %31, %28, %cst_9 {dimension_numbers = #tpu.dot_dimension_numbers<[1], [0], [0], [1], [0, 0, 1, 1], [], []>} : vector<8x64xbf16>, vector<64x256xbf16>, vector<8x256xf32> -> vector<8x256xf32>
    %33 = arith.addf %18, %32 : vector<8x256xf32>
    %34 = vector.extract_strided_slice %33 {offsets = [0, 0], sizes = [8, 192], strides = [1, 1]} : vector<8x256xf32> to vector<8x192xf32>
    %35 = arith.negf %34 : vector<8x192xf32>
    %36 = math.exp %35 : vector<8x192xf32>
    %cst_10 = arith.constant 1.000000e+00 : f32
    %37 = vector.broadcast %cst_10 : f32 to vector<8x192xf32>
    %38 = arith.addf %37, %36 : vector<8x192xf32>
    %39 = arith.divf %37, %38 : vector<8x192xf32>
    %40 = vector.extract_strided_slice %33 {offsets = [0, 192], sizes = [8, 64], strides = [1, 1]} : vector<8x256xf32> to vector<8x64xf32>
    %41 = math.tanh %40 : vector<8x64xf32>
    %42 = vector.extract_strided_slice %39 {offsets = [0, 0], sizes = [8, 64], strides = [1, 1]} : vector<8x192xf32> to vector<8x64xf32>
    %43 = vector.extract_strided_slice %39 {offsets = [0, 64], sizes = [8, 64], strides = [1, 1]} : vector<8x192xf32> to vector<8x64xf32>
    %44 = vector.extract_strided_slice %39 {offsets = [0, 128], sizes = [8, 64], strides = [1, 1]} : vector<8x192xf32> to vector<8x64xf32>
    %45 = arith.mulf %43, %30 : vector<8x64xf32>
    %46 = arith.mulf %42, %41 : vector<8x64xf32>
    %47 = arith.addf %45, %46 : vector<8x64xf32>
    %48 = math.tanh %47 : vector<8x64xf32>
    %49 = arith.mulf %44, %48 : vector<8x64xf32>
    %50 = vector.extract_strided_slice %49 {offsets = [0, 0], sizes = [8, 32], strides = [1, 1]} : vector<8x64xf32> to vector<8x32xf32>
    %51 = vector.extract_strided_slice %49 {offsets = [0, 32], sizes = [8, 32], strides = [1, 1]} : vector<8x64xf32> to vector<8x32xf32>
    %52 = arith.truncf %49 : vector<8x64xf32> to vector<8x64xbf16>
    %cst_11 = arith.constant dense<0.000000e+00> : vector<8x256xf32>
    %53 = tpu.matmul %52, %28, %cst_11 {dimension_numbers = #tpu.dot_dimension_numbers<[1], [0], [0], [1], [0, 0, 1, 1], [], []>} : vector<8x64xbf16>, vector<64x256xbf16>, vector<8x256xf32> -> vector<8x256xf32>
    %54 = arith.addf %21, %53 : vector<8x256xf32>
    %55 = vector.extract_strided_slice %54 {offsets = [0, 0], sizes = [8, 192], strides = [1, 1]} : vector<8x256xf32> to vector<8x192xf32>
    %56 = arith.negf %55 : vector<8x192xf32>
    %57 = math.exp %56 : vector<8x192xf32>
    %cst_12 = arith.constant 1.000000e+00 : f32
    %58 = vector.broadcast %cst_12 : f32 to vector<8x192xf32>
    %59 = arith.addf %58, %57 : vector<8x192xf32>
    %60 = arith.divf %58, %59 : vector<8x192xf32>
    %61 = vector.extract_strided_slice %54 {offsets = [0, 192], sizes = [8, 64], strides = [1, 1]} : vector<8x256xf32> to vector<8x64xf32>
    %62 = math.tanh %61 : vector<8x64xf32>
    %63 = vector.extract_strided_slice %60 {offsets = [0, 0], sizes = [8, 64], strides = [1, 1]} : vector<8x192xf32> to vector<8x64xf32>
    %64 = vector.extract_strided_slice %60 {offsets = [0, 64], sizes = [8, 64], strides = [1, 1]} : vector<8x192xf32> to vector<8x64xf32>
    %65 = vector.extract_strided_slice %60 {offsets = [0, 128], sizes = [8, 64], strides = [1, 1]} : vector<8x192xf32> to vector<8x64xf32>
    %66 = arith.mulf %64, %47 : vector<8x64xf32>
    %67 = arith.mulf %63, %62 : vector<8x64xf32>
    %68 = arith.addf %66, %67 : vector<8x64xf32>
    %69 = math.tanh %68 : vector<8x64xf32>
    %70 = arith.mulf %65, %69 : vector<8x64xf32>
    %71 = vector.extract_strided_slice %70 {offsets = [0, 0], sizes = [8, 32], strides = [1, 1]} : vector<8x64xf32> to vector<8x32xf32>
    %72 = vector.extract_strided_slice %70 {offsets = [0, 32], sizes = [8, 32], strides = [1, 1]} : vector<8x64xf32> to vector<8x32xf32>
    %73 = arith.truncf %70 : vector<8x64xf32> to vector<8x64xbf16>
    %cst_13 = arith.constant dense<0.000000e+00> : vector<8x256xf32>
    %74 = tpu.matmul %73, %28, %cst_13 {dimension_numbers = #tpu.dot_dimension_numbers<[1], [0], [0], [1], [0, 0, 1, 1], [], []>} : vector<8x64xbf16>, vector<64x256xbf16>, vector<8x256xf32> -> vector<8x256xf32>
    %75 = arith.addf %24, %74 : vector<8x256xf32>
    %76 = vector.extract_strided_slice %75 {offsets = [0, 0], sizes = [8, 192], strides = [1, 1]} : vector<8x256xf32> to vector<8x192xf32>
    %77 = arith.negf %76 : vector<8x192xf32>
    %78 = math.exp %77 : vector<8x192xf32>
    %cst_14 = arith.constant 1.000000e+00 : f32
    %79 = vector.broadcast %cst_14 : f32 to vector<8x192xf32>
    %80 = arith.addf %79, %78 : vector<8x192xf32>
    %81 = arith.divf %79, %80 : vector<8x192xf32>
    %82 = vector.extract_strided_slice %75 {offsets = [0, 192], sizes = [8, 64], strides = [1, 1]} : vector<8x256xf32> to vector<8x64xf32>
    %83 = math.tanh %82 : vector<8x64xf32>
    %84 = vector.extract_strided_slice %81 {offsets = [0, 0], sizes = [8, 64], strides = [1, 1]} : vector<8x192xf32> to vector<8x64xf32>
    %85 = vector.extract_strided_slice %81 {offsets = [0, 64], sizes = [8, 64], strides = [1, 1]} : vector<8x192xf32> to vector<8x64xf32>
    %86 = vector.extract_strided_slice %81 {offsets = [0, 128], sizes = [8, 64], strides = [1, 1]} : vector<8x192xf32> to vector<8x64xf32>
    %87 = arith.mulf %85, %68 : vector<8x64xf32>
    %88 = arith.mulf %84, %83 : vector<8x64xf32>
    %89 = arith.addf %87, %88 : vector<8x64xf32>
    %90 = math.tanh %89 : vector<8x64xf32>
    %91 = arith.mulf %86, %90 : vector<8x64xf32>
    %92 = vector.extract_strided_slice %91 {offsets = [0, 0], sizes = [8, 32], strides = [1, 1]} : vector<8x64xf32> to vector<8x32xf32>
    %93 = vector.extract_strided_slice %91 {offsets = [0, 32], sizes = [8, 32], strides = [1, 1]} : vector<8x64xf32> to vector<8x32xf32>
    %94 = arith.truncf %91 : vector<8x64xf32> to vector<8x64xbf16>
    %cst_15 = arith.constant dense<0.000000e+00> : vector<8x256xf32>
    %95 = tpu.matmul %94, %28, %cst_15 {dimension_numbers = #tpu.dot_dimension_numbers<[1], [0], [0], [1], [0, 0, 1, 1], [], []>} : vector<8x64xbf16>, vector<64x256xbf16>, vector<8x256xf32> -> vector<8x256xf32>
    %96 = arith.addf %27, %95 : vector<8x256xf32>
    %97 = vector.extract_strided_slice %96 {offsets = [0, 0], sizes = [8, 192], strides = [1, 1]} : vector<8x256xf32> to vector<8x192xf32>
    %98 = arith.negf %97 : vector<8x192xf32>
    %99 = math.exp %98 : vector<8x192xf32>
    %cst_16 = arith.constant 1.000000e+00 : f32
    %100 = vector.broadcast %cst_16 : f32 to vector<8x192xf32>
    %101 = arith.addf %100, %99 : vector<8x192xf32>
    %102 = arith.divf %100, %101 : vector<8x192xf32>
    %103 = vector.extract_strided_slice %96 {offsets = [0, 192], sizes = [8, 64], strides = [1, 1]} : vector<8x256xf32> to vector<8x64xf32>
    %104 = math.tanh %103 : vector<8x64xf32>
    %105 = vector.extract_strided_slice %102 {offsets = [0, 0], sizes = [8, 64], strides = [1, 1]} : vector<8x192xf32> to vector<8x64xf32>
    %106 = vector.extract_strided_slice %102 {offsets = [0, 64], sizes = [8, 64], strides = [1, 1]} : vector<8x192xf32> to vector<8x64xf32>
    %107 = vector.extract_strided_slice %102 {offsets = [0, 128], sizes = [8, 64], strides = [1, 1]} : vector<8x192xf32> to vector<8x64xf32>
    %108 = arith.mulf %106, %89 : vector<8x64xf32>
    %109 = arith.mulf %105, %104 : vector<8x64xf32>
    %110 = arith.addf %108, %109 : vector<8x64xf32>
    %111 = math.tanh %110 : vector<8x64xf32>
    %112 = arith.mulf %107, %111 : vector<8x64xf32>
    %113 = vector.extract_strided_slice %112 {offsets = [0, 0], sizes = [8, 32], strides = [1, 1]} : vector<8x64xf32> to vector<8x32xf32>
    %114 = vector.extract_strided_slice %112 {offsets = [0, 32], sizes = [8, 32], strides = [1, 1]} : vector<8x64xf32> to vector<8x32xf32>
    %115 = vector.shape_cast %50 : vector<8x32xf32> to vector<1x8x32xf32>
    %116 = vector.shape_cast %71 : vector<8x32xf32> to vector<1x8x32xf32>
    %117 = vector.shape_cast %92 : vector<8x32xf32> to vector<1x8x32xf32>
    %118 = vector.shape_cast %113 : vector<8x32xf32> to vector<1x8x32xf32>
    %119 = tpu.concatenate %115, %116, %117, %118 in 0 : vector<1x8x32xf32>, vector<1x8x32xf32>, vector<1x8x32xf32>, vector<1x8x32xf32> -> vector<4x8x32xf32>
    %120 = vector.shape_cast %114 : vector<8x32xf32> to vector<1x8x32xf32>
    %121 = vector.shape_cast %93 : vector<8x32xf32> to vector<1x8x32xf32>
    %122 = vector.shape_cast %72 : vector<8x32xf32> to vector<1x8x32xf32>
    %123 = vector.shape_cast %51 : vector<8x32xf32> to vector<1x8x32xf32>
    %124 = tpu.concatenate %120, %121, %122, %123 in 0 : vector<1x8x32xf32>, vector<1x8x32xf32>, vector<1x8x32xf32>, vector<1x8x32xf32> -> vector<4x8x32xf32>
    %125 = arith.addf %119, %124 : vector<4x8x32xf32>
    %126 = math.tanh %125 : vector<4x8x32xf32>
    %c0_17 = arith.constant 0 : index
    %c256 = arith.constant 256 : index
    %127 = vector.load %arg3[%c0_17, %c256] : memref<33x384xf32, #tpu.memory_space<vmem>>, vector<1x32xf32>
    %128 = vector.shape_cast %127 : vector<1x32xf32> to vector<1x1x32xf32>
    %129 = vector.broadcast %128 : vector<1x1x32xf32> to vector<4x8x32xf32>
    %130 = arith.mulf %126, %129 : vector<4x8x32xf32>
    %cst_18 = arith.constant dense<0.000000e+00> : vector<4x8xf32>
    %131 = vector.multi_reduction <add>, %130, %cst_18 [2] : vector<4x8x32xf32> to vector<4x8xf32>
    %132 = vector.shape_cast %131 : vector<4x8xf32> to vector<4x8x1xf32>
    %cst_19 = arith.constant dense<0xFF800000> : vector<4x1xf32>
    %133 = vector.multi_reduction <maximumf>, %132, %cst_19 [1] : vector<4x8x1xf32> to vector<4x1xf32>
    %134 = vector.shape_cast %133 : vector<4x1xf32> to vector<4x1x1xf32>
    %135 = vector.broadcast %134 : vector<4x1x1xf32> to vector<4x8x1xf32>
    %136 = arith.subf %132, %135 : vector<4x8x1xf32>
    %137 = math.exp %136 : vector<4x8x1xf32>
    %cst_20 = arith.constant dense<0.000000e+00> : vector<4x1xf32>
    %138 = vector.multi_reduction <add>, %137, %cst_20 [1] : vector<4x8x1xf32> to vector<4x1xf32>
    %139 = vector.shape_cast %138 : vector<4x1xf32> to vector<4x1x1xf32>
    %140 = vector.broadcast %139 : vector<4x1x1xf32> to vector<4x8x1xf32>
    %141 = arith.divf %137, %140 : vector<4x8x1xf32>
    %142 = vector.broadcast %141 : vector<4x8x1xf32> to vector<4x8x32xf32>
    %143 = arith.mulf %126, %142 : vector<4x8x32xf32>
    %cst_21 = arith.constant dense<0.000000e+00> : vector<4x32xf32>
    %144 = vector.multi_reduction <add>, %143, %cst_21 [1] : vector<4x8x32xf32> to vector<4x32xf32>
    %c1 = arith.constant 1 : index
    %c0_22 = arith.constant 0 : index
    %145 = vector.load %arg3[%c1, %c0_22] : memref<33x384xf32, #tpu.memory_space<vmem>>, vector<32x32xf32>
    %c0_23 = arith.constant 0 : index
    %c288 = arith.constant 288 : index
    %146 = vector.load %arg3[%c0_23, %c288] : memref<33x384xf32, #tpu.memory_space<vmem>>, vector<1x32xf32>
    %c0_24 = arith.constant 0 : index
    %c320 = arith.constant 320 : index
    %147 = vector.load %arg3[%c0_24, %c320] : memref<33x384xf32, #tpu.memory_space<vmem>>, vector<1x32xf32>
    %c0_25 = arith.constant 0 : index
    %c352 = arith.constant 352 : index
    %148 = vector.load %arg3[%c0_25, %c352] : memref<33x384xf32, #tpu.memory_space<vmem>>, vector<1x32xf32>
    %cst_26 = arith.constant dense<0.000000e+00> : vector<4x32xf32>
    %149 = tpu.matmul %144, %145, %cst_26 {dimension_numbers = #tpu.dot_dimension_numbers<[1], [0], [0], [1], [0, 0, 1, 1], [], []>} : vector<4x32xf32>, vector<32x32xf32>, vector<4x32xf32> -> vector<4x32xf32>
    %150 = vector.broadcast %146 : vector<1x32xf32> to vector<4x32xf32>
    %151 = arith.addf %149, %150 : vector<4x32xf32>
    %cst_27 = arith.constant 0.000000e+00 : f32
    %152 = vector.broadcast %cst_27 : f32 to vector<4x32xf32>
    %153 = arith.cmpf oge, %151, %152 : vector<4x32xf32>
    %cst_28 = arith.constant 0.229166672 : f32
    %154 = vector.broadcast %cst_28 : f32 to vector<4x32xf32>
    %155 = arith.mulf %151, %154 : vector<4x32xf32>
    %156 = arith.select %153, %151, %155 : vector<4x32xi1>, vector<4x32xf32>
    %157 = vector.broadcast %147 : vector<1x32xf32> to vector<4x32xf32>
    %158 = arith.mulf %156, %157 : vector<4x32xf32>
    %159 = vector.broadcast %148 : vector<1x32xf32> to vector<4x32xf32>
    %160 = arith.addf %158, %159 : vector<4x32xf32>
    %c0_29 = arith.constant 0 : index
    %c0_30 = arith.constant 0 : index
    %161 = vector.load %arg4[%c0_29, %c0_30] : memref<4x32xf32, #tpu.memory_space<vmem>>, vector<4x32xf32>
    tpu.vector_store %arg4[%c0_29, %c0_30], %160 {strides = array<i32>} : memref<4x32xf32, #tpu.memory_space<vmem>>, vector<4x32xf32>,
    return
  }
}

</mosaic_0001>

<bundles_post_ra>
// kernel: bilstm_attention_forward.1
= control target key start
LH: loop header
LB: loop body
LE: loop exit
PB: predicated region body
PF: predicated region fallthrough
CT: control target
= control target key end

     0   :  { %9 = vsyncpa [#allocation3], 0  ;;  %s1418_s0 = inlined_call_operand.vmem [shape: s32[32,1], index: 0, kind: input, shape index: {}]   ;;  %s1419_s1 = inlined_call_operand.hbm [shape: f32[64,256], index: 1, kind: input, shape index: {}]   ;;  %s1420_s2 = inlined_call_operand.hbm [shape: bf16[64,256], index: 2, kind: input, shape index: {}]   ;;  %s1421_s3 = inlined_call_operand.hbm [shape: f32[33,384], index: 3, kind: input, shape index: {}]   ;;  %s1422_s4 = inlined_call_operand.hbm [shape: f32[4,32], index: 4, kind: output, shape index: {}]  }
   0x1   :  { %10 = vsyncpa [#allocation6], 0  ;;  %s31_s17 = sshll.u32 %s1420_s2, 4  ;;  %s32_s17 = int_to_ptr.hbm [resolvable:$true] %s31_s17 }
   0x2   :  { %11 = vsyncpa [#allocation4], 0  ;;  %s1144_s18 = smov [#allocation5]   ;;  %s18_s22 = sshll.u32 %s1419_s1, 4  ;;  %s19_s22 = int_to_ptr.hbm [resolvable:$true] %s18_s22 }
   0x3   :  { %s33_s19 = sshll.u32 %s1144_s18, 4  ;;  %s1145_s23 = smov 128   ;;  %s34_s19 = int_to_ptr.vmem [resolvable:$true] %s33_s19 }
   0x4   :  { %s1146_s24 = smov 8   ;;  %s1147_s25 = smov [#allocation2]  }
   0x5   :  { %39 = dma.hbm_to_vmem [thread:$0]  %s32_s17, 1024, %s34_s19, [#allocation6], %s1145_s23, %s1145_s23, %s1146_s24  }
   0x6   :  { %s20_s26 = sshll.u32 %s1147_s25, 4  ;;  %s1148_s27 = smov 256   ;;  %s21_s26 = int_to_ptr.vmem [resolvable:$true] %s20_s26 }
   0x7   :  { %s1149_s28 = smov 16   ;;  %s44_s30 = sshll.u32 %s1421_s3, 4  ;;  %s45_s30 = int_to_ptr.hbm [resolvable:$true] %s44_s30 }
   0x8   :  { %26 = dma.hbm_to_vmem [thread:$0]  %s19_s22, 2048, %s21_s26, [#allocation3], %s1148_s27, %s1148_s27, %s1149_s28  }
   0x9   :  { %s1150_s5 = smov [#allocation7]   ;;  %s1151_s7 = smov 384  }
   0xa   :  { %s46_s6 = sshll.u32 %s1150_s5, 4  ;;  %s1152_s1 = smov 24   ;;  %s47_s6 = int_to_ptr.vmem [resolvable:$true] %s46_s6 }
   0xb   :  { %52 = dma.hbm_to_vmem [thread:$0]  %s45_s30, 1920, %s47_s6, [#allocation6], %s1151_s7, %s1151_s7, %s1152_s1  }
   0xc   :  { %1138 = dma.done.wait [#allocation3], 2048  }
   0xd   :  { %1139 = vsyncadd [#allocation3], 4294965248 }
   0xe   :  { %1140 = dma.done.wait [#allocation6], 2944  }
   0xf   :  { %1141 = vsyncadd [#allocation6], 4294964352  ;;  %v1153_v0 = vmov 0   ;;  %v66_v1 = vld [vmem:[%s1418_s0] sm:$0xff]  ;;  %v68_v2 = vld [vmem:[%s1418_s0 + $0x10] sm:$0xff]  ;;  %v70_v45 = vlaneseq  ;;  %vm118_vm0 = vcmask 523264  }
  0x10   :  { %968 = vset.pattern.permute.xlu0 %v1153_v0  ;;  %969 = vset.pattern.permute.xlu1 %v1153_v0  ;;  %v111_v3 = vld [vmem:[#allocation2 + $0x70] sm:$0xff]  ;;  %v112_v4 = vld [vmem:[#allocation2 + $0x78] sm:$0xff]  ;;  %v109_v5 = vld [vmem:[#allocation2 + $0x60] sm:$0xff]  ;;  %v1154_v48 = vmov 0.0   ;;  %s1156_s15 = smov 96   ;;  %s1157_s16 = smov 32  }
  0x11   :  { %73 = vperm.xlu0 %968, %v66_v1   ;;  %79 = vperm.xlu1 %969, %v68_v2   ;;  %v110_v6 = vld [vmem:[#allocation2 + $0x68] sm:$0xff]  ;;  %v107_v7 = vld [vmem:[#allocation2 + $0x50] sm:$0xff]  ;;  %v108_v8 = vld [vmem:[#allocation2 + $0x58] sm:$0xff]  ;;  %v71_v46 = vand.u32 127, %v70_v45  ;;  %s1158_s17 = smov [#allocation8]   ;;  %s875_s21 = sshll.u32 %s1422_s4, 4  ;;  %s876_s21 = int_to_ptr.hbm [resolvable:$true] %s875_s21 }
  0x12   :  { %139 = vmatpush.msra.mxu0 %v111_v3  ;;  %168 = vmatpush.msra.mxu1 %v112_v4  ;;  %v105_v9 = vld [vmem:[#allocation2 + $0x40] sm:$0xff]  ;;  %v106_v10 = vld [vmem:[#allocation2 + $0x48] sm:$0xff]  ;;  %v69_v12 = vld [vmem:[%s1418_s0 + $0x18] sm:$0xff]  ;;  %s873_s18 = sshll.u32 %s1158_s17, 4  ;;  %s874_s18 = int_to_ptr.vmem [resolvable:$true] %s873_s18 }
  0x13   :  { %v67_v11 = vld [vmem:[%s1418_s0 + $0x8] sm:$0xff]  ;;  %v103_v13 = vld [vmem:[#allocation2 + $0x30] sm:$0xff]  ;;  %v104_v14 = vld [vmem:[#allocation2 + $0x38] sm:$0xff]  ;;  %v189_v3 = vadd.s32 128, %v71_v46  ;;  %s1155_s0 = smov 64  }
  0x14   :  { %140 = vmatpush.msra.mxu0 %v109_v5  ;;  %169 = vmatpush.msra.mxu1 %v110_v6  ;;  %v101_v15 = vld [vmem:[#allocation2 + $0x20] sm:$0xff]  ;;  %v102_v16 = vld [vmem:[#allocation2 + $0x28] sm:$0xff]  ;;  %v99_v17 = vld [vmem:[#allocation2 + $0x10] sm:$0xff] }
  0x15   :  { %v100_v18 = vld [vmem:[#allocation2 + $0x18] sm:$0xff]  ;;  %v951_v19 = vld [vmem:[#allocation5 + $0x34] sm:$0xf]  ;;  %v97_v22 = vld [vmem:[#allocation2] sm:$0xff]  ;;  %v191_v6 = vand.u32 32, %v189_v3 }
  0x16   :  { %141 = vmatpush.msra.mxu0 %v107_v7  ;;  %170 = vmatpush.msra.mxu1 %v108_v8  ;;  %v926_v20 = vld [vmem:[#allocation5 + $0x38] sm:$0xf0]  ;;  %v98_v23 = vld [vmem:[#allocation2 + $0x8] sm:$0xff]  ;;  %v949_v24 = vld [vmem:[#allocation5 + $0x24] sm:$0xf]  ;;  %v190_v7 = vand.u32 32, %v71_v46 }
  0x17   :  { %v929_v21 = vor.u32 %v951_v19, %v926_v20  ;;  %v918_v25 = vld [vmem:[#allocation5 + $0x28] sm:$0xf0]  ;;  %v924_v27 = vld [vmem:[#allocation5 + $0x30] sm:$0xf]  ;;  %v952_v28 = vld [vmem:[#allocation5 + $0x34] sm:$0xf0] }
  0x18   :  { %142 = vmatpush.msra.mxu0 %v105_v9  ;;  %171 = vmatpush.msra.mxu1 %v106_v10  ;;  %v921_v26 = vor.u32 %v949_v24, %v918_v25  ;;  %v947_v29 = vld [vmem:[#allocation5 + $0x14] sm:$0xf]  ;;  %v925_v30 = vor.u32 %v952_v28, %v924_v27  ;;  %v910_v31 = vld [vmem:[#allocation5 + $0x18] sm:$0xf0]  ;;  %v916_v33 = vld [vmem:[#allocation5 + $0x20] sm:$0xf] }
  0x19   :  { %76 = vperm.xlu0 %968, %v67_v11   ;;  %82 = vperm.xlu1 %969, %v69_v12   ;;  %v913_v32 = vor.u32 %v947_v29, %v910_v31  ;;  %v950_v34 = vld [vmem:[#allocation5 + $0x24] sm:$0xf0]  ;;  %v945_v35 = vld [vmem:[#allocation5 + $0x4] sm:$0xf]  ;;  %v902_v37 = vld [vmem:[#allocation5 + $0x8] sm:$0xf0] }
  0x1a   :  { %143 = vmatpush.msra.mxu0 %v103_v13  ;;  %172 = vmatpush.msra.mxu1 %v104_v14  ;;  %v917_v36 = vor.u32 %v950_v34, %v916_v33  ;;  %v908_v38 = vld [vmem:[#allocation5 + $0x10] sm:$0xf]  ;;  %v948_v39 = vld [vmem:[#allocation5 + $0x14] sm:$0xf0]  ;;  %v905_v40 = vor.u32 %v945_v35, %v902_v37  ;;  %v900_v42 = vld [vmem:[#allocation5] sm:$0xf] }
  0x1b   :  { %270 = vmatpush.bf16.msra.mxu3 %v929_v21  ;;  %257 = vmatpush.bf16.msra.mxu2 %v925_v30  ;;  %v909_v41 = vor.u32 %v948_v39, %v908_v38  ;;  %v946_v43 = vld [vmem:[#allocation5 + $0x4] sm:$0xf0]  ;;  %vm1221_vm5 = vcmp.eq.s32.totalorder %v191_v6, 0  ;;  %vm1225_vm6 = vcmp.eq.s32.totalorder %v190_v7, 0 }
  0x1c   :  { %144 = vmatpush.msra.mxu0 %v101_v15  ;;  %173 = vmatpush.msra.mxu1 %v102_v16  ;;  %v901_v44 = vor.u32 %v946_v43, %v900_v42  ;;  %v96_v62 = vld [vmem:[#allocation7] ss:$8 sm:$0x3] }
  0x1d   :  { %v114_v63 = vperm.slane %v96_v62, 0 }
  0x1e   :  { %145 = vmatpush.msra.mxu0 %v99_v17  ;;  %174 = vmatpush.msra.mxu1 %v100_v18 }
  0x1f   :  { %271 = vmatpush.bf16.msra.mxu3 %v921_v26  ;;  %258 = vmatpush.bf16.msra.mxu2 %v917_v36 }
  0x20   :  { %146 = vmatpush.msra.mxu0 %v97_v22  ;;  %175 = vmatpush.msra.mxu1 %v98_v23 }
  0x22   :  { %446 = vmatpush.bf16.msrb.mxu1 %v929_v21  ;;  %433 = vmatpush.bf16.msrb.mxu0 %v925_v30 }
  0x23   :  { %272 = vmatpush.bf16.msra.mxu3 %v913_v32  ;;  %259 = vmatpush.bf16.msra.mxu2 %v909_v41 }
  0x26   :  { %447 = vmatpush.bf16.msrb.mxu1 %v921_v26  ;;  %434 = vmatpush.bf16.msrb.mxu0 %v917_v36 }
  0x27   :  { %273 = vmatpush.bf16.msra.mxu3 %v905_v40  ;;  %260 = vmatpush.bf16.msra.mxu2 %v901_v44 }
  0x2a   :  { %448 = vmatpush.bf16.msrb.mxu1 %v913_v32  ;;  %274 = vmatmul.bf16.vlgmr.msra.gmra.mxu3 %v1153_v0 }
  0x2b   :  { %358 = vmatpush.bf16.msrb.mxu3 %v929_v21  ;;  %435 = vmatpush.bf16.msrb.mxu0 %v909_v41 }
  0x2c   :  { %345 = vmatpush.bf16.msrb.mxu2 %v925_v30 }
  0x2d   :  { %261 = vmatmul.bf16.vlgmr.msra.gmra.mxu2 %v1153_v0  ;;  %v115_v0 = vperm.slane %v96_v62, 1 }
  0x2e   :  { %449 = vmatpush.bf16.msrb.mxu1 %v905_v40 }
  0x2f   :  { %359 = vmatpush.bf16.msrb.mxu3 %v921_v26  ;;  %436 = vmatpush.bf16.msrb.mxu0 %v901_v44 }
  0x30   :  { %346 = vmatpush.bf16.msrb.mxu2 %v917_v36 }
  0x33   :  { %360 = vmatpush.bf16.msrb.mxu3 %v913_v32 }
  0x34   :  { %347 = vmatpush.bf16.msrb.mxu2 %v909_v41 }
  0x37   :  { %361 = vmatpush.bf16.msrb.mxu3 %v905_v40 }
  0x38   :  { %348 = vmatpush.bf16.msrb.mxu2 %v901_v44 }
  0x3b   :  { %534 = vmatpush.bf16.msra.mxu3 %v929_v21 }
  0x3c   :  { %521 = vmatpush.bf16.msra.mxu2 %v925_v30 }
  0x3f   :  { %535 = vmatpush.bf16.msra.mxu3 %v921_v26 }
  0x40   :  { %522 = vmatpush.bf16.msra.mxu2 %v917_v36 }
  0x43   :  { %536 = vmatpush.bf16.msra.mxu3 %v913_v32 }
  0x44   :  { %523 = vmatpush.bf16.msra.mxu2 %v909_v41 }
  0x47   :  { %537 = vmatpush.bf16.msra.mxu3 %v905_v40 }
  0x48   :  { %524 = vmatpush.bf16.msra.mxu2 %v901_v44 }
  0x83   :  { %v74_v47 = vpop.permute.xlu0 %73  ;;  %v80_v51 = vpop.permute.xlu1 %79 }
  0x84   :  { %vm84_vm1 = vcmp.eq.s32.totalorder %v71_v46, %v74_v47  ;;  %vm86_vm3 = vcmp.eq.s32.totalorder %v71_v46, %v80_v51 }
  0x85   :  { %v886_v49 = vsel %vm84_vm1, 1.0, %v1154_v48  ;;  %v888_v53 = vsel %vm86_vm3, 1.0, %v1154_v48 }
  0x86   :  { %890 = vmatmul.msk.f32.vlgmr.msra.gmra.mxu0 %vm118_vm0, %v886_v49  ;;  %894 = vmatmul.msk.f32.vlgmr.msra.gmra.mxu1 %vm118_vm0, %v886_v49 }
  0x8b   :  { %v77_v50 = vpop.permute.xlu0 %76  ;;  %v83_v54 = vpop.permute.xlu1 %82 }
  0x8c   :  { %vm85_vm2 = vcmp.eq.s32.totalorder %v71_v46, %v77_v50  ;;  %vm87_vm4 = vcmp.eq.s32.totalorder %v71_v46, %v83_v54 }
  0x8d   :  { %v887_v52 = vsel %vm85_vm2, 1.0, %v1154_v48  ;;  %v889_v55 = vsel %vm87_vm4, 1.0, %v1154_v48 }
  0x8e   :  { %891 = vmatmul.msk.f32.gmra.mxu0 %vm118_vm0, %v887_v52  ;;  %895 = vmatmul.msk.f32.gmra.mxu1 %vm118_vm0, %v887_v52 }
  0x96   :  { %892 = vmatmul.msk.f32.gmra.mxu0 %vm118_vm0, %v888_v53  ;;  %896 = vmatmul.msk.f32.gmra.mxu1 %vm118_vm0, %v888_v53 }
  0x9e   :  { %893 = vmatmul.msk.f32.gmra.mxu0 %vm118_vm0, %v889_v55  ;;  %897 = vmatmul.msk.f32.gmra.mxu1 %vm118_vm0, %v889_v55 }
  0xad   :  { %v275_v56 = vpop.f32.mrf.mxu3 }
  0xb0   :  { %v262_v57 = vpop.f32.mrf.mxu2 }
  0xb5   :  { %v277_v58 = vpop.f32.mrf.mxu3 }
  0xb8   :  { %v264_v61 = vpop.f32.mrf.mxu2 }
 0x103   :  { %v148_v59 = vpop.f32.mrf.mxu0  ;;  %v177_v60 = vpop.f32.mrf.mxu1 }
 0x104   :  { %v1249_v20 = vadd.f32 %v148_v59, %v114_v63  ;;  %v1251_v21 = vadd.f32 %v177_v60, %v115_v0 }
 0x10b   :  { %v151_v1 = vpop.f32.mrf.mxu0  ;;  %v180_v2 = vpop.f32.mrf.mxu1 }
 0x10c   :  { %v1217_v4 = vadd.f32 %v151_v1, %v114_v63  ;;  %v1219_v5 = vadd.f32 %v180_v2, %v115_v0 }
 0x113   :  { %v154_v8 = vpop.f32.mrf.mxu0  ;;  %v183_v9 = vpop.f32.mrf.mxu1 }
 0x114   :  { %v1229_v12 = vadd.f32 %v154_v8, %v114_v63  ;;  %v1231_v13 = vadd.f32 %v183_v9, %v115_v0 }
 0x116   :  { %v196_v14 = vsel %vm1225_vm6, %v1217_v4, %v1229_v12  ;;  %v197_v15 = vsel %vm1221_vm5, %v1219_v5, %v1231_v13  ;;  %v198_v16 = vsel %vm1225_vm6, %v1229_v12, %v1217_v4  ;;  %v199_v17 = vsel %vm1221_vm5, %v1231_v13, %v1219_v5 }
 0x11b   :  { %v157_v18 = vpop.f32.mrf.mxu0  ;;  %v186_v19 = vpop.f32.mrf.mxu1 }
 0x11c   :  { %v1253_v22 = vadd.f32 %v157_v18, %v114_v63  ;;  %v1255_v23 = vadd.f32 %v186_v19, %v115_v0 }
 0x11e   :  { %v195_v24 = vsel %vm1221_vm5, %v1251_v21, %v1255_v23  ;;  %v200_v25 = vsel %vm1225_vm6, %v1253_v22, %v1249_v20  ;;  %v201_v26 = vsel %vm1221_vm5, %v1255_v23, %v1251_v21  ;;  %v194_v29 = vsel %vm1225_vm6, %v1249_v20, %v1253_v22 }
 0x11f   :  { %v280_v27 = vadd.f32 %v275_v56, %v195_v24  ;;  %v279_v30 = vadd.f32 %v262_v57, %v194_v29 }
 0x121   :  { %970 = vtanh.f32 %v280_v27  ;;  %v930_v31 = vmul.f32 -1.442695, %v279_v30  ;;  %v931_v50 = vmul.f32 -1.442695, %v280_v27 }
 0x123   :  { %972 = vpow2.f32 %v930_v31 }
 0x127   :  { %v971_v28 = vpop.eup %970 }
 0x128   :  { %322 = vrot.lane.b32.xlu2 %v971_v28, %s1155_s0 }
 0x129   :  { %v973_v32 = vpop.eup %972 }
 0x12a   :  { %v287_v33 = vadd.f32 1.0, %v973_v32 }
 0x12c   :  { %974 = vrcp.f32 %v287_v33  ;;  %v300_v39 = vand.u32 2147483648, %v287_v33  ;;  %vm294_vm8 = vweird.f32 %v287_v33  ;;  %v298_v40 = vand.u32 2147483647, %v287_v33 }
 0x12e   :  { %v301_v42 = vor.u32 1.1754944e-38, %v300_v39  ;;  %vm299_vm10 = vcmp.eq.f32.partialorder %v298_v40, 8.507059e+37 }
 0x132   :  { %v975_v34 = vpop.eup %974 }
 0x133   :  { %v290_v35 = vmul.f32 %v975_v34, %v287_v33  ;;  %vm295_vm7 = vweird.f32 %v975_v34 }
 0x134   :  { %vm296_vm9 = vmor %vm294_vm8, %vm295_vm7 }
 0x135   :  { %v291_v36 = vsub.f32 1.0, %v290_v35 }
 0x137   :  { %v292_v37 = vmul.f32 %v975_v34, %v291_v36 }
 0x139   :  { %v293_v38 = vadd.f32 %v975_v34, %v292_v37 }
 0x13b   :  { %v297_v41 = vsel %vm296_vm9, %v975_v34, %v293_v38 }
 0x13c   :  { %v302_v44 = vsel %vm299_vm10, %v301_v42, %v297_v41 }
 0x13d   :  { %v320_v46 = vmul.f32 0.0, %v302_v44 }
 0x182   :  { %v323_v43 = vpop.permute.xlu2 %322 }
 0x183   :  { %v325_v45 = vmul.f32 %v323_v43, %v302_v44 }
 0x185   :  { %327 = vrot.lane.b32.xlu2 %v325_v45, %s1155_s0 }
 0x1df   :  { %v328_v47 = vpop.permute.xlu2 %327 }
 0x1e0   :  { %v330_v48 = vadd.f32 %v328_v47, %v320_v46 }
 0x1e2   :  { %976 = vtanh.f32 %v330_v48 }
 0x1e3   :  { %978 = vpow2.f32 %v931_v50 }
 0x1e8   :  { %v977_v49 = vpop.eup %976 }
 0x1e9   :  { %333 = vrot.lane.b32.xlu0 %v977_v49, %s1155_s0  ;;  %v979_v51 = vpop.eup %978 }
 0x1ea   :  { %v288_v52 = vadd.f32 1.0, %v979_v51 }
 0x1ec   :  { %980 = vrcp.f32 %v288_v52  ;;  %v315_v58 = vand.u32 2147483648, %v288_v52  ;;  %vm309_vm12 = vweird.f32 %v288_v52  ;;  %v313_v59 = vand.u32 2147483647, %v288_v52 }
 0x1ee   :  { %v316_v61 = vor.u32 1.1754944e-38, %v315_v58  ;;  %vm314_vm14 = vcmp.eq.f32.partialorder %v313_v59, 8.507059e+37 }
 0x1f2   :  { %v981_v53 = vpop.eup %980 }
 0x1f3   :  { %v305_v54 = vmul.f32 %v981_v53, %v288_v52  ;;  %vm310_vm11 = vweird.f32 %v981_v53 }
 0x1f4   :  { %vm311_vm13 = vmor %vm309_vm12, %vm310_vm11 }
 0x1f5   :  { %v306_v55 = vsub.f32 1.0, %v305_v54 }
 0x1f7   :  { %v307_v56 = vmul.f32 %v981_v53, %v306_v55 }
 0x1f9   :  { %v308_v57 = vadd.f32 %v981_v53, %v307_v56 }
 0x1fb   :  { %v312_v60 = vsel %vm311_vm13, %v981_v53, %v308_v57 }
 0x1fc   :  { %v317_v62 = vsel %vm314_vm14, %v316_v61, %v312_v60 }
 0x25b   :  { %v334_v63 = vpop.permute.xlu0 %333 }
 0x25c   :  { %v1276_v0 = vmul.f32 %v334_v63, %v317_v62 }
 0x25e   :  { %v337_v1 = vpack.c.bf16 %v1276_v0, %v1276_v0 }
 0x260   :  { %932 = vmatmul.msk.bf16.vlgmr.msrb.gmra.mxu2 %vm118_vm0, %v337_v1  ;;  %933 = vmatmul.msk.bf16.vlgmr.msrb.gmra.mxu3 %vm118_vm0, %v337_v1 }
 0x2e3   :  { %v350_v2 = vpop.f32.mrf.mxu2  ;;  %v363_v3 = vpop.f32.mrf.mxu3 }
 0x2e4   :  { %v367_v6 = vadd.f32 %v350_v2, %v196_v14  ;;  %v368_v7 = vadd.f32 %v363_v3, %v197_v15 }
 0x2e6   :  { %982 = vtanh.f32 %v368_v7  ;;  %v934_v19 = vmul.f32 -1.442695, %v367_v6  ;;  %v935_v42 = vmul.f32 -1.442695, %v368_v7 }
 0x2e8   :  { %984 = vpow2.f32 %v934_v19 }
 0x2eb   :  { %v352_v8 = vpop.f32.mrf.mxu2  ;;  %v365_v9 = vpop.f32.mrf.mxu3 }
 0x2ec   :  { %v983_v18 = vpop.eup %982 }
 0x2ed   :  { %410 = vrot.lane.b32.xlu1 %v983_v18, %s1155_s0 }
 0x2ee   :  { %v985_v24 = vpop.eup %984 }
 0x2ef   :  { %v375_v27 = vadd.f32 1.0, %v985_v24 }
 0x2f1   :  { %986 = vrcp.f32 %v375_v27  ;;  %v388_v32 = vand.u32 2147483648, %v375_v27  ;;  %vm382_vm1 = vweird.f32 %v375_v27  ;;  %v386_v15 = vand.u32 2147483647, %v375_v27 }
 0x2f3   :  { %v389_v34 = vor.u32 1.1754944e-38, %v388_v32  ;;  %vm387_vm3 = vcmp.eq.f32.partialorder %v386_v15, 8.507059e+37 }
 0x2f7   :  { %v987_v28 = vpop.eup %986 }
 0x2f8   :  { %v378_v29 = vmul.f32 %v987_v28, %v375_v27  ;;  %vm383_vm15 = vweird.f32 %v987_v28 }
 0x2f9   :  { %vm384_vm2 = vmor %vm382_vm1, %vm383_vm15 }
 0x2fa   :  { %v379_v14 = vsub.f32 1.0, %v378_v29 }
 0x2fc   :  { %v380_v30 = vmul.f32 %v987_v28, %v379_v14 }
 0x2fe   :  { %v381_v31 = vadd.f32 %v987_v28, %v380_v30 }
 0x300   :  { %v385_v33 = vsel %vm384_vm2, %v987_v28, %v381_v31 }
 0x301   :  { %v390_v36 = vsel %vm387_vm3, %v389_v34, %v385_v33 }
 0x302   :  { %v408_v38 = vmul.f32 %v390_v36, %v330_v48 }
 0x35f   :  { %v411_v35 = vpop.permute.xlu1 %410 }
 0x360   :  { %v413_v37 = vmul.f32 %v411_v35, %v390_v36 }
 0x362   :  { %415 = vrot.lane.b32.xlu2 %v413_v37, %s1155_s0 }
 0x3bc   :  { %v416_v39 = vpop.permute.xlu2 %415 }
 0x3bd   :  { %v418_v40 = vadd.f32 %v416_v39, %v408_v38 }
 0x3bf   :  { %988 = vtanh.f32 %v418_v40 }
 0x3c0   :  { %990 = vpow2.f32 %v935_v42 }
 0x3c5   :  { %v989_v41 = vpop.eup %988 }
 0x3c6   :  { %421 = vrot.lane.b32.xlu0 %v989_v41, %s1155_s0  ;;  %v991_v43 = vpop.eup %990 }
 0x3c7   :  { %v376_v44 = vadd.f32 1.0, %v991_v43 }
 0x3c9   :  { %992 = vrcp.f32 %v376_v44  ;;  %v403_v51 = vand.u32 2147483648, %v376_v44  ;;  %vm397_vm7 = vweird.f32 %v376_v44  ;;  %v401_v48 = vand.u32 2147483647, %v376_v44 }
 0x3cb   :  { %v404_v53 = vor.u32 1.1754944e-38, %v403_v51  ;;  %vm402_vm9 = vcmp.eq.f32.partialorder %v401_v48, 8.507059e+37 }
 0x3cf   :  { %v993_v45 = vpop.eup %992 }
 0x3d0   :  { %v393_v46 = vmul.f32 %v993_v45, %v376_v44  ;;  %vm398_vm4 = vweird.f32 %v993_v45 }
 0x3d1   :  { %vm399_vm8 = vmor %vm397_vm7, %vm398_vm4  ;;  %vm630_vm4 = vcmask 261120  }
 0x3d2   :  { %v394_v47 = vsub.f32 1.0, %v393_v46 }
 0x3d4   :  { %v395_v49 = vmul.f32 %v993_v45, %v394_v47 }
 0x3d6   :  { %v396_v50 = vadd.f32 %v993_v45, %v395_v49 }
 0x3d8   :  { %v400_v52 = vsel %vm399_vm8, %v993_v45, %v396_v50 }
 0x3d9   :  { %v405_v54 = vsel %vm402_vm9, %v404_v53, %v400_v52 }
 0x438   :  { %v422_v55 = vpop.permute.xlu0 %421 }
 0x439   :  { %v1295_v56 = vmul.f32 %v422_v55, %v405_v54 }
 0x43b   :  { %v425_v57 = vpack.c.bf16 %v1295_v56, %v1295_v56 }
 0x43d   :  { %936 = vmatmul.msk.bf16.vlgmr.msrb.gmra.mxu0 %vm118_vm0, %v425_v57  ;;  %937 = vmatmul.msk.bf16.vlgmr.msrb.gmra.mxu1 %vm118_vm0, %v425_v57 }
 0x4ba   :  { %v438_v58 = vpop.f32.mrf.mxu0  ;;  %v451_v59 = vpop.f32.mrf.mxu1 }
 0x4bb   :  { %v455_v60 = vadd.f32 %v438_v58, %v198_v16  ;;  %v456_v61 = vadd.f32 %v451_v59, %v199_v17 }
 0x4bd   :  { %994 = vtanh.f32 %v456_v61  ;;  %v938_v2 = vmul.f32 -1.442695, %v455_v60  ;;  %v939_v30 = vmul.f32 -1.442695, %v456_v61 }
 0x4bf   :  { %996 = vpow2.f32 %v938_v2 }
 0x4c2   :  { %v440_v62 = vpop.f32.mrf.mxu0  ;;  %v453_v63 = vpop.f32.mrf.mxu1 }
 0x4c3   :  { %v995_v1 = vpop.eup %994 }
 0x4c4   :  { %498 = vrot.lane.b32.xlu1 %v995_v1, %s1155_s0 }
 0x4c5   :  { %v997_v3 = vpop.eup %996 }
 0x4c6   :  { %v463_v6 = vadd.f32 1.0, %v997_v3 }
 0x4c8   :  { %998 = vrcp.f32 %v463_v6  ;;  %v476_v9 = vand.u32 2147483648, %v463_v6  ;;  %vm470_vm11 = vweird.f32 %v463_v6  ;;  %v474_v5 = vand.u32 2147483647, %v463_v6 }
 0x4ca   :  { %v477_v17 = vor.u32 1.1754944e-38, %v476_v9  ;;  %vm475_vm13 = vcmp.eq.f32.partialorder %v474_v5, 8.507059e+37 }
 0x4ce   :  { %v999_v7 = vpop.eup %998 }
 0x4cf   :  { %v466_v4 = vmul.f32 %v999_v7, %v463_v6  ;;  %vm471_vm10 = vweird.f32 %v999_v7  ;;  %v625_v6 = vld [vmem:[#allocation7 + $0x10] ss:$0 sm:$0xff] }
 0x4d0   :  { %vm472_vm12 = vmor %vm470_vm11, %vm471_vm10  ;;  %vm815_vm11 = vcmask 1046528  }
 0x4d1   :  { %v467_v12 = vsub.f32 1.0, %v466_v4 }
 0x4d3   :  { %v468_v16 = vmul.f32 %v999_v7, %v467_v12 }
 0x4d5   :  { %v469_v8 = vadd.f32 %v999_v7, %v468_v16 }
 0x4d7   :  { %v473_v13 = vsel %vm472_vm12, %v999_v7, %v469_v8 }
 0x4d8   :  { %v478_v19 = vsel %vm475_vm13, %v477_v17, %v473_v13 }
 0x4d9   :  { %v496_v27 = vmul.f32 %v478_v19, %v418_v40 }
 0x536   :  { %v499_v18 = vpop.permute.xlu1 %498 }
 0x537   :  { %v501_v24 = vmul.f32 %v499_v18, %v478_v19 }
 0x539   :  { %503 = vrot.lane.b32.xlu2 %v501_v24, %s1155_s0 }
 0x593   :  { %v504_v28 = vpop.permute.xlu2 %503 }
 0x594   :  { %v506_v29 = vadd.f32 %v504_v28, %v496_v27 }
 0x596   :  { %1000 = vtanh.f32 %v506_v29 }
 0x597   :  { %1002 = vpow2.f32 %v939_v30 }
 0x59c   :  { %v1001_v14 = vpop.eup %1000 }
 0x59d   :  { %509 = vrot.lane.b32.xlu0 %v1001_v14, %s1155_s0  ;;  %v1003_v31 = vpop.eup %1002 }
 0x59e   :  { %v464_v32 = vadd.f32 1.0, %v1003_v31 }
 0x5a0   :  { %1004 = vrcp.f32 %v464_v32  ;;  %v491_v37 = vand.u32 2147483648, %v464_v32  ;;  %vm485_vm15 = vweird.f32 %v464_v32  ;;  %v489_v38 = vand.u32 2147483647, %v464_v32 }
 0x5a2   :  { %v492_v40 = vor.u32 1.1754944e-38, %v491_v37  ;;  %vm490_vm2 = vcmp.eq.f32.partialorder %v489_v38, 8.507059e+37 }
 0x5a6   :  { %v1005_v15 = vpop.eup %1004 }
 0x5a7   :  { %v481_v33 = vmul.f32 %v1005_v15, %v464_v32  ;;  %vm486_vm14 = vweird.f32 %v1005_v15 }
 0x5a8   :  { %vm487_vm1 = vmor %vm485_vm15, %vm486_vm14 }
 0x5a9   :  { %v482_v34 = vsub.f32 1.0, %v481_v33 }
 0x5ab   :  { %v483_v35 = vmul.f32 %v1005_v15, %v482_v34 }
 0x5ad   :  { %v484_v36 = vadd.f32 %v1005_v15, %v483_v35 }
 0x5af   :  { %v488_v39 = vsel %vm487_vm1, %v1005_v15, %v484_v36 }
 0x5b0   :  { %v493_v41 = vsel %vm490_vm2, %v492_v40, %v488_v39 }
 0x60f   :  { %v510_v42 = vpop.permute.xlu0 %509 }
 0x610   :  { %v1314_v43 = vmul.f32 %v510_v42, %v493_v41 }
 0x612   :  { %v513_v44 = vpack.c.bf16 %v1314_v43, %v1314_v43 }
 0x614   :  { %940 = vmatmul.msk.bf16.vlgmr.msra.gmra.mxu2 %vm118_vm0, %v513_v44  ;;  %941 = vmatmul.msk.bf16.vlgmr.msra.gmra.mxu3 %vm118_vm0, %v513_v44 }
 0x697   :  { %v526_v45 = vpop.f32.mrf.mxu2  ;;  %v539_v46 = vpop.f32.mrf.mxu3 }
 0x698   :  { %v543_v47 = vadd.f32 %v526_v45, %v200_v25  ;;  %v544_v49 = vadd.f32 %v539_v46, %v201_v26 }
 0x69a   :  { %1006 = vtanh.f32 %v544_v49  ;;  %v942_v52 = vmul.f32 -1.442695, %v543_v47  ;;  %v943_v12 = vmul.f32 -1.442695, %v544_v49 }
 0x69c   :  { %1008 = vpow2.f32 %v942_v52 }
 0x69f   :  { %v528_v50 = vpop.f32.mrf.mxu2  ;;  %v541_v51 = vpop.f32.mrf.mxu3 }
 0x6a0   :  { %v1007_v48 = vpop.eup %1006 }
 0x6a1   :  { %586 = vrot.lane.b32.xlu1 %v1007_v48, %s1155_s0 }
 0x6a2   :  { %v1009_v53 = vpop.eup %1008 }
 0x6a3   :  { %v551_v11 = vadd.f32 1.0, %v1009_v53 }
 0x6a5   :  { %1010 = vrcp.f32 %v551_v11  ;;  %v564_v55 = vand.u32 2147483648, %v551_v11  ;;  %vm558_vm5 = vweird.f32 %v551_v11  ;;  %v562_v21 = vand.u32 2147483647, %v551_v11 }
 0x6a7   :  { %v565_v26 = vor.u32 1.1754944e-38, %v564_v55  ;;  %vm563_vm3 = vcmp.eq.f32.partialorder %v562_v21, 8.507059e+37 }
 0x6ab   :  { %v1011_v54 = vpop.eup %1010 }
 0x6ac   :  { %v554_v20 = vmul.f32 %v1011_v54, %v551_v11  ;;  %vm559_vm0 = vweird.f32 %v1011_v54 }
 0x6ad   :  { %vm560_vm6 = vmor %vm558_vm5, %vm559_vm0 }
 0x6ae   :  { %v555_v22 = vsub.f32 1.0, %v554_v20 }
 0x6b0   :  { %v556_v25 = vmul.f32 %v1011_v54, %v555_v22 }
 0x6b2   :  { %v557_v10 = vadd.f32 %v1011_v54, %v556_v25 }
 0x6b4   :  { %v561_v23 = vsel %vm560_vm6, %v1011_v54, %v557_v10 }
 0x6b5   :  { %v566_v58 = vsel %vm563_vm3, %v565_v26, %v561_v23 }
 0x6b6   :  { %v584_v60 = vmul.f32 %v566_v58, %v506_v29 }
 0x713   :  { %v587_v57 = vpop.permute.xlu1 %586 }
 0x714   :  { %v589_v59 = vmul.f32 %v587_v57, %v566_v58 }
 0x716   :  { %591 = vrot.lane.b32.xlu2 %v589_v59, %s1155_s0 }
 0x71e   :  { %607 = vrot.lane.b32.xlu2 %v1314_v43, %s1156_s15 }
 0x770   :  { %v592_v61 = vpop.permute.xlu2 %591 }
 0x771   :  { %v594_v62 = vadd.f32 %v592_v61, %v584_v60 }
 0x773   :  { %1012 = vtanh.f32 %v594_v62 }
 0x778   :  { %v608_v1 = vpop.permute.xlu2 %607 }
 0x779   :  { %v1013_v63 = vpop.eup %1012  ;;  %v618_v2 = vadd.f32 %v608_v1, %v1295_v56 }
 0x77a   :  { %597 = vrot.lane.b32.xlu0 %v1013_v63, %s1155_s0 }
 0x77b   :  { %1014 = vtanh.f32 %v618_v2 }
 0x77c   :  { %1016 = vpow2.f32 %v943_v12 }
 0x781   :  { %v1338_v3 = vpop.eup %1014 }
 0x782   :  { %609 = vrot.lane.b32.xlu0 %v1295_v56, %s1156_s15  ;;  %v627_v7 = vmul.f32 %v1338_v3, %v625_v6  ;;  %v1017_v16 = vpop.eup %1016 }
 0x783   :  { %v552_v8 = vadd.f32 1.0, %v1017_v16 }
 0x784   :  { %v634_v4 = vsel %vm630_vm4, %v627_v7, 0.0 }
 0x785   :  { %1018 = vrcp.f32 %v552_v8  ;;  %v579_v18 = vand.u32 2147483648, %v552_v8  ;;  %vm573_vm8 = vweird.f32 %v552_v8  ;;  %v577_v19 = vand.u32 2147483647, %v552_v8 }
 0x787   :  { %v580_v27 = vor.u32 1.1754944e-38, %v579_v18  ;;  %vm578_vm10 = vcmp.eq.f32.partialorder %v577_v19, 8.507059e+37 }
 0x78b   :  { %v1019_v9 = vpop.eup %1018 }
 0x78c   :  { %v569_v5 = vmul.f32 %v1019_v9, %v552_v8  ;;  %vm574_vm7 = vweird.f32 %v1019_v9 }
 0x78d   :  { %vm575_vm9 = vmor %vm573_vm8, %vm574_vm7 }
 0x78e   :  { %v570_v56 = vsub.f32 1.0, %v569_v5 }
 0x790   :  { %v571_v13 = vmul.f32 %v1019_v9, %v570_v56 }
 0x792   :  { %v572_v17 = vadd.f32 %v1019_v9, %v571_v13 }
 0x794   :  { %v576_v24 = vsel %vm575_vm9, %v1019_v9, %v572_v17 }
 0x795   :  { %v581_v28 = vsel %vm578_vm10, %v580_v27, %v576_v24 }
 0x7ac   :  { %635 = vadd.xlane.f32.xlu0 %v634_v4 }
 0x7c0   :  { %858 = vrot.lane.b32.xlu0 %v625_v6, %s1155_s0 }
 0x7ec   :  { %v598_v29 = vpop.permute.xlu0 %597 }
 0x7ed   :  { %v600_v14 = vmul.f32 %v598_v29, %v581_v28 }
 0x7ef   :  { %605 = vrot.lane.b32.xlu1 %v600_v14, %s1156_s15 }
 0x7f4   :  { %v610_v30 = vpop.permute.xlu0 %609 }
 0x7f5   :  { %v619_v31 = vadd.f32 %v610_v30, %v1314_v43 }
 0x7f7   :  { %611 = vrot.lane.b32.xlu1 %v1276_v0, %s1156_s15  ;;  %1020 = vtanh.f32 %v619_v31 }
 0x7fd   :  { %v1347_v32 = vpop.eup %1020 }
 0x7fe   :  { %v628_v15 = vmul.f32 %v1347_v32, %v625_v6 }
 0x800   :  { %v637_v33 = vsel %vm630_vm4, %v628_v15, 0.0 }
 0x821   :  { %638 = vadd.xlane.f32.xlu1 %v637_v33 }
 0x83a   :  { %862 = vrot.lane.b32.xlu1 %v625_v6, %s1157_s16 }
 0x861   :  { %v606_v34 = vpop.permute.xlu1 %605 }
 0x862   :  { %v617_v35 = vadd.f32 %v606_v34, %v1276_v0  ;;  %v636_v0 = vpop.xlane.xlu0 %635  ;;  %v798_v34 = vld [vmem:[#allocation7 + $0x48] sm:$0xff] }
 0x863   :  { %v649_v44 = vrot.slane %v636_v0, 4 }
 0x864   :  { %1022 = vtanh.f32 %v617_v35  ;;  %v799_v35 = vld [vmem:[#allocation7 + $0x60] sm:$0x1] }
 0x865   :  { %v650_v46 = vmax.f32 %v636_v0, %v649_v44 }
 0x867   :  { %v651_v49 = vrot.slane %v650_v46, 2 }
 0x869   :  { %v612_v36 = vpop.permute.xlu1 %611  ;;  %v652_v51 = vmax.f32 %v650_v46, %v651_v49 }
 0x86a   :  { %v1352_v37 = vpop.eup %1022  ;;  %v620_v38 = vadd.f32 %v612_v36, %v600_v14  ;;  %v797_v36 = vld [vmem:[#allocation7 + $0x30] sm:$0xff] }
 0x86b   :  { %v626_v39 = vmul.f32 %v1352_v37, %v625_v6  ;;  %v653_v52 = vrot.slane %v652_v51, 1 }
 0x86c   :  { %1024 = vtanh.f32 %v620_v38  ;;  %v821_v38 = vrot.slane %v798_v34, 1 }
 0x86d   :  { %v631_v40 = vsel %vm630_vm4, %v626_v39, 0.0  ;;  %v654_v11 = vmax.f32 %v652_v51, %v653_v52  ;;  %v823_v39 = vrot.slane %v799_v35, 1 }
 0x86e   :  { %632 = vadd.xlane.f32.xlu2 %v631_v40  ;;  %v819_v40 = vrot.slane %v797_v36, 1 }
 0x86f   :  { %v668_v20 = vsub.f32 %v636_v0, %v654_v11 }
 0x870   :  { %v822_v51 = vsel %vm815_vm11, %v819_v40, %v821_v38 }
 0x871   :  { %v673_v25 = vmul.f32 1.442695, %v668_v20 }
 0x872   :  { %v1356_v41 = vpop.eup %1024 }
 0x873   :  { %v629_v42 = vmul.f32 %v1356_v41, %v625_v6  ;;  %1026 = vpow2.f32 %v673_v25 }
 0x875   :  { %v640_v43 = vsel %vm630_vm4, %v629_v42, 0.0  ;;  %v796_v42 = vld [vmem:[#allocation7 + $0x18] sm:$0xff] }
 0x876   :  { %641 = vadd.xlane.f32.xlu2 %v640_v43  ;;  %v795_v43 = vld [vmem:[#allocation7] sm:$0xfe] }
 0x879   :  { %v1361_v21 = vpop.eup %1026 }
 0x87a   :  { %v685_v23 = vrot.slane %v1361_v21, 4 }
 0x87c   :  { %v686_v57 = vadd.f32 %v1361_v21, %v685_v23 }
 0x87e   :  { %v687_v59 = vrot.slane %v686_v57, 2 }
 0x880   :  { %v688_v61 = vadd.f32 %v687_v59, %v686_v57 }
 0x882   :  { %v689_v2 = vrot.slane %v688_v61, 1 }
 0x884   :  { %v1369_v12 = vadd.f32 %v689_v2, %v688_v61 }
 0x886   :  { %v729_v59 = vand.u32 2147483648, %v1369_v12  ;;  %vm723_vm13 = vweird.f32 %v1369_v12 }
 0x88e   :  { %830 = vrot.lane.b32.xlu2 %v625_v6, %s1156_s15 }
 0x894   :  { %v639_v45 = vpop.xlane.xlu1 %638 }
 0x895   :  { %v655_v47 = vrot.slane %v639_v45, 4 }
 0x897   :  { %v656_v50 = vmax.f32 %v639_v45, %v655_v47  ;;  %v817_v47 = vrot.slane %v796_v42, 1 }
 0x899   :  { %v657_v48 = vrot.slane %v656_v50, 2 }
 0x89b   :  { %v658_v53 = vmax.f32 %v656_v50, %v657_v48  ;;  %v824_v50 = vsel %vm815_vm11, %v821_v38, %v823_v39  ;;  %v816_v48 = vrot.slane %v795_v43, 1 }
 0x89c   :  { %847 = vmatpush.msra.mxu0 %v824_v50 }
 0x89d   :  { %v659_v54 = vrot.slane %v658_v53, 1 }
 0x89e   :  { %848 = vmatpush.msra.mxu0 %v822_v51 }
 0x89f   :  { %v660_v22 = vmax.f32 %v658_v53, %v659_v54  ;;  %v820_v53 = vsel %vm815_vm11, %v817_v47, %v819_v40 }
 0x8a0   :  { %849 = vmatpush.msra.mxu0 %v820_v53 }
 0x8a1   :  { %v669_v10 = vsub.f32 %v639_v45, %v660_v22  ;;  %v818_v22 = vsel %vm815_vm11, %v816_v48, %v817_v47 }
 0x8a2   :  { %850 = vmatpush.msra.mxu0 %v818_v22 }
 0x8a3   :  { %v675_v55 = vmul.f32 1.442695, %v669_v10 }
 0x8a5   :  { %1028 = vpow2.f32 %v675_v55 }
 0x8a6   :  { %1030 = vrcp.f32 %v1369_v12 }
 0x8ab   :  { %v1364_v26 = vpop.eup %1028 }
 0x8ac   :  { %v691_v58 = vrot.slane %v1364_v26, 4  ;;  %v1031_v29 = vpop.eup %1030 }
 0x8ad   :  { %v719_v30 = vmul.f32 %v1031_v29, %v1369_v12  ;;  %vm724_vm12 = vweird.f32 %v1031_v29 }
 0x8ae   :  { %v692_v60 = vadd.f32 %v1364_v26, %v691_v58  ;;  %vm725_vm14 = vmor %vm723_vm13, %vm724_vm12  ;;  %vm804_vm13 = vcmask 1041409  }
 0x8af   :  { %v720_v44 = vsub.f32 1.0, %v719_v30 }
 0x8b0   :  { %v693_v62 = vrot.slane %v692_v60, 2 }
 0x8b1   :  { %v721_v54 = vmul.f32 %v1031_v29, %v720_v44 }
 0x8b2   :  { %v694_v6 = vadd.f32 %v693_v62, %v692_v60  ;;  %v727_v60 = vand.u32 2147483647, %v1369_v12 }
 0x8b3   :  { %v722_v23 = vadd.f32 %v1031_v29, %v721_v54 }
 0x8b4   :  { %v695_v16 = vrot.slane %v694_v6, 1  ;;  %vm728_vm2 = vcmp.eq.f32.partialorder %v727_v60, 8.507059e+37 }
 0x8b6   :  { %v1372_v13 = vadd.f32 %v695_v16, %v694_v6  ;;  %v730_v6 = vor.u32 1.1754944e-38, %v729_v59 }
 0x8b8   :  { %1032 = vrcp.f32 %v1372_v13  ;;  %v744_v2 = vand.u32 2147483648, %v1372_v13  ;;  %vm738_vm1 = vweird.f32 %v1372_v13 }
 0x8be   :  { %v1376_v15 = vpop.eup %1032 }
 0x8bf   :  { %v734_v45 = vmul.f32 %v1376_v15, %v1372_v13  ;;  %vm739_vm15 = vweird.f32 %v1376_v15 }
 0x8c0   :  { %vm740_vm0 = vmor %vm738_vm1, %vm739_vm15  ;;  %vm808_vm15 = vcmask 1043459  }
 0x8c1   :  { %v735_v11 = vsub.f32 1.0, %v734_v45 }
 0x8c3   :  { %v736_v55 = vmul.f32 %v1376_v15, %v735_v11 }
 0x8e1   :  { %v633_v63 = vpop.xlane.xlu2 %632 }
 0x8e2   :  { %v643_v1 = vrot.slane %v633_v63, 4 }
 0x8e4   :  { %v644_v7 = vmax.f32 %v633_v63, %v643_v1  ;;  %v726_v1 = vsel %vm725_vm14, %v1031_v29, %v722_v23  ;;  %vm806_vm14 = vcmask 1042434  }
 0x8e5   :  { %v731_v12 = vsel %vm728_vm2, %v730_v6, %v726_v1  ;;  %vm866_vm2 = vcmask 257024  }
 0x8e6   :  { %v645_v4 = vrot.slane %v644_v7, 2 }
 0x8e8   :  { %v646_v8 = vmax.f32 %v644_v7, %v645_v4  ;;  %v742_v7 = vand.u32 2147483647, %v1372_v13 }
 0x8e9   :  { %v642_v9 = vpop.xlane.xlu2 %641 }
 0x8ea   :  { %v647_v5 = vrot.slane %v646_v8, 1  ;;  %v661_v56 = vrot.slane %v642_v9, 4  ;;  %vm743_vm5 = vcmp.eq.f32.partialorder %v742_v7, 8.507059e+37 }
 0x8ec   :  { %v648_v17 = vmax.f32 %v646_v8, %v647_v5  ;;  %v662_v18 = vmax.f32 %v642_v9, %v661_v56 }
 0x8ee   :  { %v667_v19 = vsub.f32 %v633_v63, %v648_v17  ;;  %v663_v24 = vrot.slane %v662_v18, 2  ;;  %v737_v63 = vadd.f32 %v1376_v15, %v736_v55  ;;  %v732_v17 = vmul.f32 %v1361_v21, %v731_v12 }
 0x8f0   :  { %v671_v27 = vmul.f32 1.442695, %v667_v19  ;;  %v664_v28 = vmax.f32 %v662_v18, %v663_v24  ;;  %v741_v16 = vsel %vm740_vm0, %v1376_v15, %v737_v63  ;;  %v764_v29 = vmul.f32 %v1338_v3, %v732_v17  ;;  %v859_v17 = vpop.permute.xlu0 %858 }
 0x8f2   :  { %1034 = vpow2.f32 %v671_v27  ;;  %v665_v14 = vrot.slane %v664_v28, 1  ;;  %v774_v21 = vsel %vm630_vm4, %v764_v29, 0.0 }
 0x8f3   :  { %v775_v39 = vrot.slane %v774_v21, 4 }
 0x8f4   :  { %v666_v31 = vmax.f32 %v664_v28, %v665_v14 }
 0x8f5   :  { %v776_v47 = vadd.f32 %v775_v39, %v774_v21 }
 0x8f6   :  { %v670_v33 = vsub.f32 %v642_v9, %v666_v31  ;;  %v745_v9 = vor.u32 1.1754944e-38, %v744_v2 }
 0x8f7   :  { %v777_v11 = vrot.slane %v776_v47, 2 }
 0x8f8   :  { %v1378_v0 = vpop.eup %1034  ;;  %v677_v46 = vmul.f32 1.442695, %v670_v33  ;;  %v746_v18 = vsel %vm743_vm5, %v745_v9, %v741_v16 }
 0x8f9   :  { %v679_v49 = vrot.slane %v1378_v0, 4  ;;  %v747_v27 = vmul.f32 %v1364_v26, %v746_v18  ;;  %v778_v55 = vadd.f32 %v777_v11, %v776_v47 }
 0x8fa   :  { %1036 = vpow2.f32 %v677_v46 }
 0x8fb   :  { %v680_v52 = vadd.f32 %v1378_v0, %v679_v49  ;;  %v765_v15 = vmul.f32 %v1347_v32, %v747_v27  ;;  %v779_v60 = vrot.slane %v778_v55, 1 }
 0x8fd   :  { %v681_v20 = vrot.slane %v680_v52, 2  ;;  %v781_v3 = vsel %vm630_vm4, %v765_v15, 0.0  ;;  %v780_v2 = vadd.f32 %v779_v60, %v778_v55 }
 0x8fe   :  { %v782_v45 = vrot.slane %v781_v3, 4 }
 0x8ff   :  { %v682_v25 = vadd.f32 %v681_v20, %v680_v52 }
 0x900   :  { %v1388_v10 = vpop.eup %1036  ;;  %v783_v52 = vadd.f32 %v782_v45, %v781_v3 }
 0x901   :  { %v683_v57 = vrot.slane %v682_v25, 1  ;;  %v697_v58 = vrot.slane %v1388_v10, 4 }
 0x903   :  { %v684_v61 = vadd.f32 %v683_v57, %v682_v25  ;;  %v698_v62 = vadd.f32 %v1388_v10, %v697_v58  ;;  %v784_v25 = vrot.slane %v783_v52, 2 }
 0x905   :  { %1038 = vrcp.f32 %v684_v61  ;;  %v699_v4 = vrot.slane %v698_v62, 2  ;;  %v714_v13 = vand.u32 2147483648, %v684_v61  ;;  %v712_v30 = vand.u32 2147483647, %v684_v61 }
 0x906   :  { %vm708_vm3 = vweird.f32 %v684_v61  ;;  %v785_v59 = vadd.f32 %v784_v25, %v783_v52 }
 0x907   :  { %v700_v8 = vadd.f32 %v699_v4, %v698_v62  ;;  %v715_v33 = vor.u32 1.1754944e-38, %v714_v13  ;;  %vm713_vm8 = vcmp.eq.f32.partialorder %v712_v30, 8.507059e+37 }
 0x908   :  { %v786_v1 = vrot.slane %v785_v59, 1 }
 0x909   :  { %v701_v5 = vrot.slane %v700_v8, 1 }
 0x90b   :  { %v1039_v56 = vpop.eup %1038  ;;  %v702_v24 = vadd.f32 %v701_v5, %v700_v8  ;;  %v831_v8 = vpop.permute.xlu2 %830 }
 0x90c   :  { %v704_v19 = vmul.f32 %v1039_v56, %v684_v61  ;;  %vm709_vm6 = vweird.f32 %v1039_v56 }
 0x90d   :  { %1040 = vrcp.f32 %v702_v24  ;;  %vm710_vm7 = vmor %vm708_vm3, %vm709_vm6  ;;  %v759_v42 = vand.u32 2147483648, %v702_v24  ;;  %v757_v32 = vand.u32 2147483647, %v702_v24  ;;  %vm753_vm10 = vweird.f32 %v702_v24 }
 0x90e   :  { %v705_v28 = vsub.f32 1.0, %v704_v19  ;;  %v863_v19 = vpop.permute.xlu1 %862 }
 0x90f   :  { %v760_v51 = vor.u32 1.1754944e-38, %v759_v42  ;;  %vm758_vm12 = vcmp.eq.f32.partialorder %v757_v32, 8.507059e+37 }
 0x910   :  { %v706_v14 = vmul.f32 %v1039_v56, %v705_v28 }
 0x912   :  { %v707_v31 = vadd.f32 %v1039_v56, %v706_v14 }
 0x913   :  { %v1041_v34 = vpop.eup %1040 }
 0x914   :  { %v711_v35 = vsel %vm710_vm7, %v1039_v56, %v707_v31  ;;  %v749_v36 = vmul.f32 %v1041_v34, %v702_v24  ;;  %vm754_vm9 = vweird.f32 %v1041_v34 }
 0x915   :  { %v716_v26 = vsel %vm713_vm8, %v715_v33, %v711_v35  ;;  %vm755_vm11 = vmor %vm753_vm10, %vm754_vm9 }
 0x916   :  { %v717_v38 = vmul.f32 %v1378_v0, %v716_v26  ;;  %v750_v40 = vsub.f32 1.0, %v749_v36 }
 0x918   :  { %v763_v43 = vmul.f32 %v1352_v37, %v717_v38  ;;  %v751_v44 = vmul.f32 %v1041_v34, %v750_v40 }
 0x91a   :  { %v767_v46 = vsel %vm630_vm4, %v763_v43, 0.0  ;;  %v752_v49 = vadd.f32 %v1041_v34, %v751_v44 }
 0x91b   :  { %v768_v50 = vrot.slane %v767_v46, 4 }
 0x91c   :  { %v756_v0 = vsel %vm755_vm11, %v1041_v34, %v752_v49 }
 0x91d   :  { %v769_v48 = vadd.f32 %v768_v50, %v767_v46  ;;  %v761_v53 = vsel %vm758_vm12, %v760_v51, %v756_v0 }
 0x91e   :  { %v762_v37 = vmul.f32 %v1388_v10, %v761_v53 }
 0x91f   :  { %v770_v54 = vrot.slane %v769_v48, 2 }
 0x920   :  { %v766_v20 = vmul.f32 %v1356_v41, %v762_v37  ;;  %v787_v41 = vadd.f32 %v786_v1, %v785_v59 }
 0x921   :  { %v771_v22 = vadd.f32 %v770_v54, %v769_v48 }
 0x922   :  { %v788_v23 = vsel %vm630_vm4, %v766_v20, 0.0 }
 0x923   :  { %v772_v57 = vrot.slane %v771_v22, 1  ;;  %v789_v58 = vrot.slane %v788_v23, 4 }
 0x925   :  { %v790_v61 = vadd.f32 %v789_v58, %v788_v23  ;;  %v773_v62 = vadd.f32 %v772_v57, %v771_v22 }
 0x927   :  { %v791_v63 = vrot.slane %v790_v61, 2  ;;  %v805_v7 = vsel %vm804_vm13, %v780_v2, %v773_v62 }
 0x928   :  { %v807_v12 = vsel %vm806_vm14, %v787_v41, %v805_v7 }
 0x929   :  { %v792_v6 = vadd.f32 %v791_v63, %v790_v61 }
 0x92b   :  { %v793_v10 = vrot.slane %v792_v6, 1 }
 0x92d   :  { %v794_v4 = vadd.f32 %v793_v10, %v792_v6 }
 0x92f   :  { %v809_v16 = vsel %vm808_vm15, %v794_v4, %v807_v12 }
 0x930   :  { %944 = vmatmul.msk.f32.vlgmr.msra.gmra.mxu0 %vm630_vm4, %v809_v16 }
 0x9ad   :  { %v852_v9 = vpop.f32.mrf.mxu0 }
 0x9ae   :  { %v853_v5 = vadd.f32 %v852_v9, %v831_v8 }
 0x9b0   :  { %v856_v56 = vmul.f32 0.22916667, %v853_v5  ;;  %vm855_vm1 = vcmp.ge.f32.partialorder %v853_v5, 0.0 }
 0x9b2   :  { %v857_v18 = vsel %vm855_vm1, %v853_v5, %v856_v56 }
 0x9b3   :  { %v861_v24 = vmul.f32 %v859_v17, %v857_v18 }
 0x9b5   :  { %v865_v27 = vadd.f32 %v863_v19, %v861_v24 }
 0x9b7   :  { %867 = vst.msk [vmem:[#allocation8] sm:$0xf] %vm866_vm2, %v865_v27 }
 0x9b8   :  { %878 = dma.vmem_to_hbm [thread:$0]  %s874_s18, 64, %s876_s21, [#allocation4]  }
 0x9b9   :  { %1142 = dma.done.wait [#allocation4], 64  }
 0x9ba   :  { %1143 = vsyncadd [#allocation4], 4294967232 }
 0x9bb   :  { %883 = vsyncpa [#allocation3], 1 }
 0x9bc   :  { %884 = vsyncpa [#allocation6], 1 }
 0x9bd   :  { %885 = vsyncpa [#allocation4], 1 }

</bundles_post_ra>
